<compile_context>
chip_gen: v7x
topology: tpu7x:2x2x1
jax: 0.10.0
libtpu: 0.0.40
codegen_flags: <defaults>
</compile_context>

<pallas_src>
import functools

import jax
import jax.numpy as jnp
from jax.experimental import pallas as pl
from jax.experimental.pallas import tpu as pltpu


def _round_up(x, m):
    return ((x + m - 1) // m) * m


def _pad2d(x, rows, cols, dtype=None):
    """Zero-pad a 2-D array up to (rows, cols), optionally casting."""
    dtype = dtype or x.dtype
    out = jnp.zeros((rows, cols), dtype)
    return out.at[: x.shape[0], : x.shape[1]].set(x.astype(dtype))


def _actor_kernel(s_ref, w1_ref, b1_ref, w2_ref, b2_ref, w3_ref, b3_ref, o_ref,
                  *, max_action):
    # Layer 1: Linear + ReLU (bf16 MXU matmul, f32 accumulate, f32 epilogue).
    a = jnp.dot(s_ref[...], w1_ref[...], preferred_element_type=jnp.float32)
    a = jnp.maximum(a + b1_ref[...], 0.0)
    # Layer 2: Linear + ReLU.
    a = jnp.dot(a.astype(jnp.bfloat16), w2_ref[...],
                preferred_element_type=jnp.float32)
    a = jnp.maximum(a + b2_ref[...], 0.0)
    # Layer 3: Linear + tanh * max_action (tanh on EUP, in f32).
    a = jnp.dot(a.astype(jnp.bfloat16), w3_ref[...],
                preferred_element_type=jnp.float32)
    o_ref[...] = (max_action * jnp.tanh(a + b3_ref[...])).astype(o_ref.dtype)


def prepare_actor_params(params):
    """Pad + cast the weights ONCE (hoisted out of the per-call forward path).

    Weights become bf16 MXU operands; biases stay f32 for the VPU epilogue.
    """
    w1, b1, w2, b2, w3, b3 = params
    S, H1 = w1.shape
    H2 = w2.shape[1]
    A = w3.shape[1]
    S_pad = _round_up(S, 32)     # small K pad for layer 1 (was 128)
    A_pad = _round_up(A, 128)    # lane-dense output columns

    w1_p = _pad2d(w1, S_pad, H1, jnp.bfloat16)
    w2_p = w2.astype(jnp.bfloat16)
    w3_p = _pad2d(w3, H2, A_pad, jnp.bfloat16)
    b1_p = b1.reshape(1, H1).astype(jnp.float32)
    b2_p = b2.reshape(1, H2).astype(jnp.float32)
    b3_p = _pad2d(b3.reshape(1, A), 1, A_pad, jnp.float32)
    return (w1_p, b1_p, w2_p, b2_p, w3_p, b3_p)


@functools.partial(jax.jit, static_argnames=("action_dim", "max_action"))
def actor_forward(state, prepared_params, action_dim, max_action):
    """Run the Actor MLP as a batch-tiled Pallas kernel (takes prepared params)."""
    w1_p, b1_p, w2_p, b2_p, w3_p, b3_p = prepared_params
    B, _ = state.shape
    S_pad, H1 = w1_p.shape
    H2 = w2_p.shape[1]
    A_pad = w3_p.shape[1]

    # Batch tile: big tiles (up to 1024 rows) to amortize per-step overhead;
    # for B >= 256 size the tile so the grid has >= 2 steps (v7x 2-TC sharding).
    if B >= 256:
        TB = min(1024, _round_up(pl.cdiv(B, 2), 16))
    else:
        TB = _round_up(max(B, 8), 16)
    B_pad = _round_up(B, TB)

    # State pad/cast (only 32 cols; fused into this jitted program).
    # NOTE: state is cast to bf16 for the layer-1 MXU pass; keep it f32 here if
    # unnormalized observations ever make bf16 precision an issue.
    state_p = _pad2d(state, B_pad, S_pad, jnp.bfloat16)

    kernel = functools.partial(_actor_kernel, max_action=float(max_action))

    out = pl.pallas_call(
        kernel,
        out_shape=jax.ShapeDtypeStruct((B_pad, A_pad), jnp.bfloat16),
        grid_spec=pl.GridSpec(
            grid=(B_pad // TB,),
            in_specs=[
                pl.BlockSpec((TB, S_pad), lambda i: (i, 0)),   # state tile (streamed)
                pl.BlockSpec((S_pad, H1), lambda i: (0, 0)),   # w1 (resident)
                pl.BlockSpec((1, H1),     lambda i: (0, 0)),   # b1 (resident)
                pl.BlockSpec((H1, H2),    lambda i: (0, 0)),   # w2 (resident)
                pl.BlockSpec((1, H2),     lambda i: (0, 0)),   # b2 (resident)
                pl.BlockSpec((H2, A_pad), lambda i: (0, 0)),   # w3 (resident)
                pl.BlockSpec((1, A_pad),  lambda i: (0, 0)),   # b3 (resident)
            ],
            out_specs=pl.BlockSpec((TB, A_pad), lambda i: (i, 0)),
        ),
        compiler_params=pltpu.CompilerParams(
            dimension_semantics=("parallel",)),
    )(state_p, w1_p, b1_p, w2_p, b2_p, w3_p, b3_p)

    # Slice the real rows/columns back off and upcast to f32 (module semantics).
    return out[:B, :action_dim].astype(jnp.float32)


def init_actor_params(key, state_dim, action_dim, hidden_dim=(256, 256)):
    """Deterministic synthetic parameters (shapes match nn.Linear in the module)."""
    k1, k2, k3, k4, k5, k6 = jax.random.split(key, 6)
    # Stored as (in, out); biases kept 2D (1, out) for clean lane layout.
    w1 = jax.random.normal(k1, (state_dim, hidden_dim[0]), jnp.float32) * 0.1
    b1 = jax.random.normal(k2, (1, hidden_dim[0]), jnp.float32) * 0.1
    w2 = jax.random.normal(k3, (hidden_dim[0], hidden_dim[1]), jnp.float32) * 0.1
    b2 = jax.random.normal(k4, (1, hidden_dim[1]), jnp.float32) * 0.1
    w3 = jax.random.normal(k5, (hidden_dim[1], action_dim), jnp.float32) * 0.1
    b3 = jax.random.normal(k6, (1, action_dim), jnp.float32) * 0.1
    return (w1, b1, w2, b2, w3, b3)


def actor_reference(state, params, max_action, mm_dtype=jnp.float32):
    """Pure-JAX reference. mm_dtype=bf16 mirrors the kernel's MXU precision."""
    w1, b1, w2, b2, w3, b3 = params
    c = lambda x: x.astype(mm_dtype)
    a = jnp.dot(c(state), c(w1), preferred_element_type=jnp.float32) + b1
    a = jnp.maximum(a, 0.0)
    a = jnp.dot(c(a), c(w2), preferred_element_type=jnp.float32) + b2
    a = jnp.maximum(a, 0.0)
    a = jnp.dot(c(a), c(w3), preferred_element_type=jnp.float32) + b3
    return max_action * jnp.tanh(a)


if __name__ == "__main__":
    key = jax.random.PRNGKey(0)
    kp, kx, kx2 = jax.random.split(key, 3)

    state_dim = 17       # e.g. a small MuJoCo-like observation dim
    action_dim = 6
    hidden_dim = (256, 256)
    max_action = 1.0

    params = init_actor_params(kp, state_dim, action_dim, hidden_dim)
    prepared = prepare_actor_params(params)   # padded/cast once, reused per call

    # --- small rollout-style batch ---
    batch = 8
    state = jax.random.normal(kx, (batch, state_dim), jnp.float32)
    out = actor_forward(state, prepared, action_dim, max_action)
    out = jax.block_until_ready(out)
    assert out.shape == (batch, action_dim)

    # Check vs a bf16-matmul reference (same MXU precision; output was stored bf16).
    ref_bf16 = actor_reference(state, params, max_action, mm_dtype=jnp.bfloat16)
    assert jnp.allclose(out, ref_bf16, atol=1e-2, rtol=1e-2), \
        "mismatch vs bf16-precision reference (small batch)"
    # Loose check vs the full-f32 PyTorch-equivalent reference.
    ref_f32 = actor_reference(state, params, max_action, mm_dtype=jnp.float32)
    assert jnp.allclose(out, ref_f32, atol=5e-2, rtol=5e-2), \
        "mismatch vs f32 reference (small batch)"

    # --- larger batch: exercises the multi-step grid + row padding path ---
    batch2 = 300
    state2 = jax.random.normal(kx2, (batch2, state_dim), jnp.float32)
    out2 = actor_forward(state2, prepared, action_dim, max_action)
    out2 = jax.block_until_ready(out2)
    assert out2.shape == (batch2, action_dim)
    ref2_bf16 = actor_reference(state2, params, max_action, mm_dtype=jnp.bfloat16)
    assert jnp.allclose(out2, ref2_bf16, atol=1e-2, rtol=1e-2), \
        "mismatch vs bf16-precision reference (large batch)"
    ref2_f32 = actor_reference(state2, params, max_action, mm_dtype=jnp.float32)
    assert jnp.allclose(out2, ref2_f32, atol=5e-2, rtol=5e-2), \
        "mismatch vs f32 reference (large batch)"

    print("KERNEL_OK")
</pallas_src>

<mosaic_0001>
module attributes {stable_mosaic.version = 11 : i64} {
  func.func @_actor_kernel(%arg0: i32, %arg1: memref<16x32xbf16, #tpu.memory_space<vmem>>, %arg2: memref<32x256xbf16, #tpu.memory_space<vmem>>, %arg3: memref<1x256xf32, #tpu.memory_space<vmem>>, %arg4: memref<256x256xbf16, #tpu.memory_space<vmem>>, %arg5: memref<1x256xf32, #tpu.memory_space<vmem>>, %arg6: memref<256x128xbf16, #tpu.memory_space<vmem>>, %arg7: memref<1x128xf32, #tpu.memory_space<vmem>>, %arg8: memref<16x128xbf16, #tpu.memory_space<vmem>>) attributes {dimension_semantics = [#tpu.dimension_semantics<parallel>], iteration_bounds = array<i64: 1>, scalar_prefetch = 0 : i64, scratch_operands = 0 : i64, tpu.core_type = #tpu.core_type<tc>, window_params = [{transform_indices = @transform_0, window_bounds = array<i64: 16, 32>}, {pipeline_mode = #tpu.pipeline_mode<synchronous>, transform_indices = @transform_1, window_bounds = array<i64: 32, 256>}, {pipeline_mode = #tpu.pipeline_mode<synchronous>, transform_indices = @transform_2, window_bounds = array<i64: 1, 256>}, {pipeline_mode = #tpu.pipeline_mode<synchronous>, transform_indices = @transform_3, window_bounds = array<i64: 256, 256>}, {pipeline_mode = #tpu.pipeline_mode<synchronous>, transform_indices = @transform_4, window_bounds = array<i64: 1, 256>}, {pipeline_mode = #tpu.pipeline_mode<synchronous>, transform_indices = @transform_5, window_bounds = array<i64: 256, 128>}, {pipeline_mode = #tpu.pipeline_mode<synchronous>, transform_indices = @transform_6, window_bounds = array<i64: 1, 128>}, {transform_indices = @transform_7, window_bounds = array<i64: 16, 128>}]} {
    %c0 = arith.constant 0 : index
    %c0_0 = arith.constant 0 : index
    %0 = vector.load %arg1[%c0, %c0_0] : memref<16x32xbf16, #tpu.memory_space<vmem>>, vector<16x32xbf16>
    %c0_1 = arith.constant 0 : index
    %c0_2 = arith.constant 0 : index
    %1 = vector.load %arg2[%c0_1, %c0_2] : memref<32x256xbf16, #tpu.memory_space<vmem>>, vector<32x256xbf16>
    %cst = arith.constant dense<0.000000e+00> : vector<16x256xf32>
    %2 = tpu.matmul %0, %1, %cst {dimension_numbers = #tpu.dot_dimension_numbers<[1], [0], [0], [1], [0, 0, 1, 1], [], []>} : vector<16x32xbf16>, vector<32x256xbf16>, vector<16x256xf32> -> vector<16x256xf32>
    %c0_3 = arith.constant 0 : index
    %c0_4 = arith.constant 0 : index
    %3 = vector.load %arg3[%c0_3, %c0_4] : memref<1x256xf32, #tpu.memory_space<vmem>>, vector<1x256xf32>
    %4 = vector.broadcast %3 : vector<1x256xf32> to vector<16x256xf32>
    %5 = arith.addf %2, %4 : vector<16x256xf32>
    %cst_5 = arith.constant 0.000000e+00 : f32
    %6 = vector.broadcast %cst_5 : f32 to vector<16x256xf32>
    %7 = arith.maximumf %5, %6 : vector<16x256xf32>
    %8 = arith.truncf %7 : vector<16x256xf32> to vector<16x256xbf16>
    %c0_6 = arith.constant 0 : index
    %c0_7 = arith.constant 0 : index
    %9 = vector.load %arg4[%c0_6, %c0_7] : memref<256x256xbf16, #tpu.memory_space<vmem>>, vector<256x256xbf16>
    %cst_8 = arith.constant dense<0.000000e+00> : vector<16x256xf32>
    %10 = tpu.matmul %8, %9, %cst_8 {dimension_numbers = #tpu.dot_dimension_numbers<[1], [0], [0], [1], [0, 0, 1, 1], [], []>} : vector<16x256xbf16>, vector<256x256xbf16>, vector<16x256xf32> -> vector<16x256xf32>
    %c0_9 = arith.constant 0 : index
    %c0_10 = arith.constant 0 : index
    %11 = vector.load %arg5[%c0_9, %c0_10] : memref<1x256xf32, #tpu.memory_space<vmem>>, vector<1x256xf32>
    %12 = vector.broadcast %11 : vector<1x256xf32> to vector<16x256xf32>
    %13 = arith.addf %10, %12 : vector<16x256xf32>
    %cst_11 = arith.constant 0.000000e+00 : f32
    %14 = vector.broadcast %cst_11 : f32 to vector<16x256xf32>
    %15 = arith.maximumf %13, %14 : vector<16x256xf32>
    %16 = arith.truncf %15 : vector<16x256xf32> to vector<16x256xbf16>
    %c0_12 = arith.constant 0 : index
    %c0_13 = arith.constant 0 : index
    %17 = vector.load %arg6[%c0_12, %c0_13] : memref<256x128xbf16, #tpu.memory_space<vmem>>, vector<256x128xbf16>
    %cst_14 = arith.constant dense<0.000000e+00> : vector<16x128xf32>
    %18 = tpu.matmul %16, %17, %cst_14 {dimension_numbers = #tpu.dot_dimension_numbers<[1], [0], [0], [1], [0, 0, 1, 1], [], []>} : vector<16x256xbf16>, vector<256x128xbf16>, vector<16x128xf32> -> vector<16x128xf32>
    %c0_15 = arith.constant 0 : index
    %c0_16 = arith.constant 0 : index
    %19 = vector.load %arg7[%c0_15, %c0_16] : memref<1x128xf32, #tpu.memory_space<vmem>>, vector<1x128xf32>
    %20 = vector.broadcast %19 : vector<1x128xf32> to vector<16x128xf32>
    %21 = arith.addf %18, %20 : vector<16x128xf32>
    %22 = math.tanh %21 : vector<16x128xf32>
    %cst_17 = arith.constant 1.000000e+00 : f32
    %23 = vector.broadcast %cst_17 : f32 to vector<16x128xf32>
    %24 = arith.mulf %23, %22 : vector<16x128xf32>
    %25 = arith.truncf %24 : vector<16x128xf32> to vector<16x128xbf16>
    %c0_18 = arith.constant 0 : index
    %c0_19 = arith.constant 0 : index
    %26 = vector.load %arg8[%c0_18, %c0_19] : memref<16x128xbf16, #tpu.memory_space<vmem>>, vector<16x128xbf16>
    tpu.vector_store %arg8[%c0_18, %c0_19], %25 {strides = array<i32>} : memref<16x128xbf16, #tpu.memory_space<vmem>>, vector<16x128xbf16>,
    return
  }
  func.func @transform_0(%arg0: i32) -> (i32, i32) {
    %c0_i32 = arith.constant 0 : i32
    %c0_i32_0 = arith.constant 0 : i32
    return %arg0, %c0_i32 : i32, i32
  }
  func.func @transform_1(%arg0: i32) -> (i32, i32) {
    %c0_i32 = arith.constant 0 : i32
    %c0_i32_0 = arith.constant 0 : i32
    %c0_i32_1 = arith.constant 0 : i32
    return %c0_i32, %c0_i32_0 : i32, i32
  }
  func.func @transform_2(%arg0: i32) -> (i32, i32) {
    %c0_i32 = arith.constant 0 : i32
    %c0_i32_0 = arith.constant 0 : i32
    %c0_i32_1 = arith.constant 0 : i32
    return %c0_i32, %c0_i32_0 : i32, i32
  }
  func.func @transform_3(%arg0: i32) -> (i32, i32) {
    %c0_i32 = arith.constant 0 : i32
    %c0_i32_0 = arith.constant 0 : i32
    %c0_i32_1 = arith.constant 0 : i32
    return %c0_i32, %c0_i32_0 : i32, i32
  }
  func.func @transform_4(%arg0: i32) -> (i32, i32) {
    %c0_i32 = arith.constant 0 : i32
    %c0_i32_0 = arith.constant 0 : i32
    %c0_i32_1 = arith.constant 0 : i32
    return %c0_i32, %c0_i32_0 : i32, i32
  }
  func.func @transform_5(%arg0: i32) -> (i32, i32) {
    %c0_i32 = arith.constant 0 : i32
    %c0_i32_0 = arith.constant 0 : i32
    %c0_i32_1 = arith.constant 0 : i32
    return %c0_i32, %c0_i32_0 : i32, i32
  }
  func.func @transform_6(%arg0: i32) -> (i32, i32) {
    %c0_i32 = arith.constant 0 : i32
    %c0_i32_0 = arith.constant 0 : i32
    %c0_i32_1 = arith.constant 0 : i32
    return %c0_i32, %c0_i32_0 : i32, i32
  }
  func.func @transform_7(%arg0: i32) -> (i32, i32) {
    %c0_i32 = arith.constant 0 : i32
    %c0_i32_0 = arith.constant 0 : i32
    return %arg0, %c0_i32 : i32, i32
  }
}

</mosaic_0001>

<bundles_post_ra>
// kernel: actor_forward.1
= control target key start
LH: loop header
LB: loop body
LE: loop exit
PB: predicated region body
PF: predicated region fallthrough
CT: control target
= control target key end

     0   :  { %12 = vsyncpa [#allocation3], 0  ;;  %s956_s0 = inlined_call_operand.vmem [shape: bf16[16,32], index: 0, kind: input, shape index: {}]   ;;  %s957_s1 = inlined_call_operand.hbm [shape: bf16[32,256], index: 1, kind: input, shape index: {}]   ;;  %s958_s2 = inlined_call_operand.vmem [shape: f32[1,256], index: 2, kind: input, shape index: {}]   ;;  %s959_s3 = inlined_call_operand.hbm [shape: bf16[256,256], index: 3, kind: input, shape index: {}]   ;;  %s960_s4 = inlined_call_operand.vmem [shape: f32[1,256], index: 4, kind: input, shape index: {}]   ;;  %s961_s5 = inlined_call_operand.hbm [shape: bf16[256,128], index: 5, kind: input, shape index: {}]   ;;  %s962_s6 = inlined_call_operand.vmem [shape: f32[1,128], index: 6, kind: input, shape index: {}]   ;;  %s963_s7 = inlined_call_operand.vmem [shape: bf16[16,128], index: 7, kind: output, shape index: {}]  }
   0x1   :  { %13 = vsyncpa [#allocation5], 0  ;;  %s850_s24 = smov [#allocation4]   ;;  %s851_s26 = smov [#allocation2]  }
   0x2   :  { %s35_s25 = sshll.u32 %s850_s24, 4  ;;  %s21_s27 = sshll.u32 %s851_s26, 4  ;;  %s36_s25 = int_to_ptr.vmem [resolvable:$true] %s35_s25  ;;  %s898_s27 = int_to_ptr.vmem [resolvable:$true] %s21_s27 }
   0x3   :  { %s780_s30 = scalar_lea.hbm %s959_s3, 4096 }
   0x4   :  { %p781_p0 = scmp.ne.s32.totalorder %s959_s3, %s780_s30  ;;  %p784_p1 = scmp.lt.u32.totalorder %s780_s30, %s959_s3 }
   0x6   :  { %p786_p2 = pnand %p784_p1, %p781_p0 }
   0x8   :  { %789 = shalt.err (!%p786_p2)
}
   0x9   :  { %s790_s12 = scalar_lea.vmem %s36_s25, 4096  ;;  %p795_p4 = scmp.lt.s32.totalorder %s36_s25, %s36_s25 }
   0xa   :  { %p791_p3 = scmp.ne.s32.totalorder %s36_s25, %s790_s12  ;;  %p796_p5 = scmp.lt.s32.totalorder %s790_s12, %s790_s12 }
   0xc   :  { %p797_p6 = por %p796_p5, %p795_p4 }
   0xe   :  { %p798_p7 = pnand %p797_p6, %p791_p3 }
  0x10   :  { %801 = shalt.err (!%p798_p7)
}
  0x11   :  { %s852_s13 = smov 128   ;;  %s853_s14 = smov 8  }
  0x12   :  { %41 = dma.hbm_to_vmem [thread:$0]  %s959_s3, 4096, %s36_s25, [#allocation5], %s852_s13, %s852_s13, %s853_s14  }
  0x13   :  { %s802_s19 = scalar_lea.hbm %s957_s1, 512 }
  0x14   :  { %p803_p8 = scmp.ne.s32.totalorder %s957_s1, %s802_s19  ;;  %p806_p9 = scmp.lt.u32.totalorder %s802_s19, %s957_s1 }
  0x16   :  { %p808_p10 = pnand %p806_p9, %p803_p8 }
  0x18   :  { %811 = shalt.err (!%p808_p10)
}
  0x19   :  { %s812_s24 = scalar_lea.vmem %s898_s27, 512  ;;  %p817_p12 = scmp.lt.s32.totalorder %s898_s27, %s898_s27 }
  0x1a   :  { %p813_p11 = scmp.ne.s32.totalorder %s898_s27, %s812_s24  ;;  %p818_p13 = scmp.lt.s32.totalorder %s812_s24, %s812_s24 }
  0x1c   :  { %p819_p0 = por %p818_p13, %p817_p12 }
  0x1e   :  { %p820_p1 = pnand %p819_p0, %p813_p11 }
  0x20   :  { %823 = shalt.err (!%p820_p1)
}
  0x21   :  { %27 = dma.hbm_to_vmem [thread:$0]  %s957_s1, 512, %s898_s27, [#allocation3], %s852_s13, %s852_s13, %s853_s14  }
  0x22   :  { %s854_s26 = smov [#allocation6]   ;;  %s824_s8 = scalar_lea.hbm %s961_s5, 2048 }
  0x23   :  { %s49_s28 = sshll.u32 %s854_s26, 4  ;;  %p825_p2 = scmp.ne.s32.totalorder %s961_s5, %s824_s8  ;;  %s50_s28 = int_to_ptr.vmem [resolvable:$true] %s49_s28 }
  0x24   :  { %p828_p3 = scmp.lt.u32.totalorder %s824_s8, %s961_s5 }
  0x26   :  { %p830_p4 = pnand %p828_p3, %p825_p2 }
  0x28   :  { %833 = shalt.err (!%p830_p4)
}
  0x29   :  { %s834_s15 = scalar_lea.vmem %s50_s28, 2048  ;;  %p839_p6 = scmp.lt.s32.totalorder %s50_s28, %s50_s28 }
  0x2a   :  { %p835_p5 = scmp.ne.s32.totalorder %s50_s28, %s834_s15  ;;  %p840_p7 = scmp.lt.s32.totalorder %s834_s15, %s834_s15 }
  0x2c   :  { %p841_p8 = por %p840_p7, %p839_p6 }
  0x2e   :  { %p842_p9 = pnand %p841_p8, %p835_p5 }
  0x30   :  { %845 = shalt.err (!%p842_p9)
}
  0x31   :  { %s855_s1 = smov 64   ;;  %s856_s27 = smov 4  }
  0x32   :  { %55 = dma.hbm_to_vmem [thread:$0]  %s961_s5, 2048, %s50_s28, [#allocation5], %s855_s1, %s855_s1, %s856_s27  }
  0x33   :  { %846 = dma.done.wait [#allocation3], 512  }
  0x34   :  { %847 = vsyncadd [#allocation3], 4294966784 }
  0x35   :  { %848 = dma.done.wait [#allocation5], 6144  }
  0x36   :  { %849 = vsyncadd [#allocation5], 4294961152  ;;  %v857_v0 = vmov 0   ;;  %v705_v1 = vld [vmem:[#allocation2 + $0x4] ss:$8 sps:$4 sm:$0xff]   ;;  %vm111_vm0 = vcmask 261120   ;;  %v76_v49 = vlaneseq }
  0x37   :  { %147 = vmatprep.mubr.bf16.mxu0 %v857_v0  ;;  %v707_v2 = vld [vmem:[#allocation2] ss:$8 sps:$4 sm:$0xff]   ;;  %115 = vmatprep.subr.bf16.mxu0 %v705_v1  ;;  %v708_v3 = vld [vmem:[#allocation2 + $0x14] ss:$8 sps:$4 sm:$0xff]   ;;  %v710_v4 = vld [vmem:[#allocation2 + $0x10] ss:$8 sps:$4 sm:$0xff]  }
  0x38   :  { %116 = vmatpush1.bf16.msra.mxu0 %v707_v2  ;;  %v712_v5 = vld [vmem:[#allocation4 + $0x4] ss:$8 sps:$4 sm:$0xff]   ;;  %v714_v6 = vld [vmem:[#allocation4] ss:$8 sps:$4 sm:$0xff]   ;;  %v715_v7 = vld [vmem:[#allocation4 + $0x14] ss:$8 sps:$4 sm:$0xff]  }
  0x39   :  { %117 = vmatprep.subr.bf16.mxu0 %v708_v3  ;;  %v711_v8 = vld [vmem:[%s956_s0] sm:$0xff]   ;;  %368 = vmatprep.subr.bf16.mxu1 %v712_v5  ;;  %v717_v9 = vld [vmem:[#allocation4 + $0x10] ss:$8 sps:$4 sm:$0xff]   ;;  %v721_v12 = vld [vmem:[#allocation4 + $0x34] ss:$8 sps:$4 sm:$0xff]   ;;  %v77_v50 = vshrl.u32 %v76_v49, 7 }
  0x3a   :  { %369 = vmatpush1.bf16.msra.mxu1 %v714_v6  ;;  %v718_v10 = vld [vmem:[#allocation4 + $0x24] ss:$8 sps:$4 sm:$0xff]   ;;  %v720_v11 = vld [vmem:[#allocation4 + $0x20] ss:$8 sps:$4 sm:$0xff]   ;;  %v723_v13 = vld [vmem:[#allocation4 + $0x30] ss:$8 sps:$4 sm:$0xff]  }
  0x3b   :  { %370 = vmatprep.subr.bf16.mxu1 %v715_v7  ;;  %v724_v14 = vld [vmem:[#allocation4 + $0x44] ss:$8 sps:$4 sm:$0xff]   ;;  %v726_v15 = vld [vmem:[#allocation4 + $0x40] ss:$8 sps:$4 sm:$0xff]   ;;  %v727_v16 = vld [vmem:[#allocation4 + $0x54] ss:$8 sps:$4 sm:$0xff]  }
  0x3c   :  { %118 = vmatpush1.bf16.msra.mxu0 %v710_v4  ;;  %v729_v17 = vld [vmem:[#allocation4 + $0x50] ss:$8 sps:$4 sm:$0xff]   ;;  %v730_v18 = vld [vmem:[#allocation4 + $0x64] ss:$8 sps:$4 sm:$0xff]   ;;  %v732_v19 = vld [vmem:[#allocation4 + $0x60] ss:$8 sps:$4 sm:$0xff]  }
  0x3d   :  { %v733_v20 = vld [vmem:[#allocation4 + $0x74] ss:$8 sps:$4 sm:$0xff]   ;;  %v735_v21 = vld [vmem:[#allocation4 + $0x70] ss:$8 sps:$4 sm:$0xff]   ;;  %v736_v22 = vld [vmem:[#allocation4 + $0x84] ss:$8 sps:$4 sm:$0xff]  }
  0x3e   :  { %371 = vmatpush1.bf16.msra.mxu1 %v717_v9  ;;  %v738_v23 = vld [vmem:[#allocation4 + $0x80] ss:$8 sps:$4 sm:$0xff]   ;;  %v739_v24 = vld [vmem:[#allocation4 + $0x94] ss:$8 sps:$4 sm:$0xff]   ;;  %v741_v25 = vld [vmem:[#allocation4 + $0x90] ss:$8 sps:$4 sm:$0xff]  }
  0x3f   :  { %616 = vmatmul.mubr.msk.bf16.vlgmr.msra.gmra.mrb[0].mxu0 %vm111_vm0, %v711_v8  ;;  %372 = vmatprep.subr.bf16.mxu1 %v718_v10  ;;  %v742_v26 = vld [vmem:[#allocation4 + $0xa4] ss:$8 sps:$4 sm:$0xff]   ;;  %v744_v27 = vld [vmem:[#allocation4 + $0xa0] ss:$8 sps:$4 sm:$0xff]   ;;  %v745_v28 = vld [vmem:[#allocation4 + $0xb4] ss:$8 sps:$4 sm:$0xff]  }
  0x40   :  { %v747_v29 = vld [vmem:[#allocation4 + $0xb0] ss:$8 sps:$4 sm:$0xff]   ;;  %v748_v30 = vld [vmem:[#allocation4 + $0xc4] ss:$8 sps:$4 sm:$0xff]   ;;  %v750_v31 = vld [vmem:[#allocation4 + $0xc0] ss:$8 sps:$4 sm:$0xff]  }
  0x41   :  { %v751_v32 = vld [vmem:[#allocation4 + $0xd4] ss:$8 sps:$4 sm:$0xff]   ;;  %v753_v33 = vld [vmem:[#allocation4 + $0xd0] ss:$8 sps:$4 sm:$0xff]   ;;  %v754_v34 = vld [vmem:[#allocation4 + $0xe4] ss:$8 sps:$4 sm:$0xff]  }
  0x42   :  { %373 = vmatpush1.bf16.msra.mxu1 %v720_v11  ;;  %v756_v35 = vld [vmem:[#allocation4 + $0xe0] ss:$8 sps:$4 sm:$0xff]   ;;  %v757_v36 = vld [vmem:[#allocation4 + $0xf4] ss:$8 sps:$4 sm:$0xff]   ;;  %v759_v37 = vld [vmem:[#allocation4 + $0xf0] ss:$8 sps:$4 sm:$0xff]  }
  0x43   :  { %374 = vmatprep.subr.bf16.mxu1 %v721_v12  ;;  %v760_v38 = vld [vmem:[#allocation6 + $0x40] sm:$0xff]   ;;  %v762_v40 = vld [vmem:[#allocation6 + $0x48] sm:$0xff]   ;;  %v764_v42 = vld [vmem:[#allocation6 + $0x50] sm:$0xff]   ;;  %v78_v51 = vsub.s32 0, %v77_v50  ;;  %v82_v53 = vsub.s32 1, %v77_v50 }
  0x44   :  { %v761_v39 = vld [vmem:[#allocation6] sm:$0xff]   ;;  %675 = vmatprep.subr.bf16.mxu0 %v760_v38  ;;  %v763_v41 = vld [vmem:[#allocation6 + $0x8] sm:$0xff]   ;;  %v765_v43 = vld [vmem:[#allocation6 + $0x10] sm:$0xff]  }
  0x45   :  { %676 = vmatpush3.bf16.msra.mxu0 %v761_v39  ;;  %v766_v44 = vld [vmem:[#allocation6 + $0x58] sm:$0xff]   ;;  %v768_v46 = vld [vmem:[#allocation6 + $0x60] sm:$0xff]   ;;  %v770_v48 = vld [vmem:[#allocation6 + $0x68] sm:$0xff]  }
  0x46   :  { %375 = vmatpush1.bf16.msra.mxu1 %v723_v13  ;;  %677 = vmatprep.subr.bf16.mxu0 %v762_v40  ;;  %v767_v45 = vld [vmem:[#allocation6 + $0x18] sm:$0xff]   ;;  %v769_v47 = vld [vmem:[#allocation6 + $0x20] sm:$0xff]   ;;  %v771_v6 = vld [vmem:[#allocation6 + $0x28] sm:$0xff]  }
  0x47   :  { %376 = vmatprep.subr.bf16.mxu1 %v724_v14  ;;  %v74_v52 = vld [vmem:[%s958_s2] sm:$0x3]  ;;  %v772_v7 = vld [vmem:[#allocation6 + $0x70] sm:$0xff]   ;;  %v774_v9 = vld [vmem:[#allocation6 + $0x78] sm:$0xff]  }
  0x48   :  { %v79_v54 = vrot.slane %v74_v52, %v78_v51  ;;  %v83_v55 = vrot.slane %v74_v52, %v82_v53  ;;  %v773_v8 = vld [vmem:[#allocation6 + $0x30] sm:$0xff]   ;;  %v775_v10 = vld [vmem:[#allocation6 + $0x38] sm:$0xff]   ;;  %v196_v11 = vld [vmem:[%s960_s4] sm:$0x3] }
  0x49   :  { %678 = vmatpush3.bf16.msra.mxu0 %v763_v41  ;;  %v201_v12 = vrot.slane %v196_v11, %v78_v51  ;;  %v205_v13 = vrot.slane %v196_v11, %v82_v53 }
  0x4a   :  { %377 = vmatpush1.bf16.msra.mxu1 %v726_v15  ;;  %679 = vmatprep.subr.bf16.mxu0 %v764_v42 }
  0x4b   :  { %378 = vmatprep.subr.bf16.mxu1 %v727_v16 }
  0x4d   :  { %680 = vmatpush3.bf16.msra.mxu0 %v765_v43 }
  0x4e   :  { %379 = vmatpush1.bf16.msra.mxu1 %v729_v17  ;;  %681 = vmatprep.subr.bf16.mxu0 %v766_v44 }
  0x4f   :  { %380 = vmatprep.subr.bf16.mxu1 %v730_v18 }
  0x51   :  { %682 = vmatpush3.bf16.msra.mxu0 %v767_v45 }
  0x52   :  { %381 = vmatpush1.bf16.msra.mxu1 %v732_v19  ;;  %683 = vmatprep.subr.bf16.mxu0 %v768_v46 }
  0x53   :  { %382 = vmatprep.subr.bf16.mxu1 %v733_v20 }
  0x55   :  { %684 = vmatpush3.bf16.msra.mxu0 %v769_v47 }
  0x56   :  { %383 = vmatpush1.bf16.msra.mxu1 %v735_v21  ;;  %685 = vmatprep.subr.bf16.mxu0 %v770_v48 }
  0x57   :  { %384 = vmatprep.subr.bf16.mxu1 %v736_v22 }
  0x59   :  { %686 = vmatpush3.bf16.msra.mxu0 %v771_v6 }
  0x5a   :  { %385 = vmatpush1.bf16.msra.mxu1 %v738_v23  ;;  %687 = vmatprep.subr.bf16.mxu0 %v772_v7 }
  0x5b   :  { %386 = vmatprep.subr.bf16.mxu1 %v739_v24 }
  0x5d   :  { %688 = vmatpush3.bf16.msra.mxu0 %v773_v8 }
  0x5e   :  { %387 = vmatpush1.bf16.msra.mxu1 %v741_v25  ;;  %689 = vmatprep.subr.bf16.mxu0 %v774_v9 }
  0x5f   :  { %388 = vmatprep.subr.bf16.mxu1 %v742_v26 }
  0x61   :  { %690 = vmatpush3.bf16.msra.mxu0 %v775_v10 }
  0x62   :  { %389 = vmatpush1.bf16.msra.mxu1 %v744_v27 }
  0x63   :  { %390 = vmatprep.subr.bf16.mxu1 %v745_v28 }
  0x66   :  { %391 = vmatpush1.bf16.msra.mxu1 %v747_v29  ;;  %v649_v29 = vld [vmem:[%s962_s6] ss:$0 sm:$0xff] }
  0x67   :  { %392 = vmatprep.subr.bf16.mxu1 %v748_v30 }
  0x6a   :  { %393 = vmatpush1.bf16.msra.mxu1 %v750_v31 }
  0x6b   :  { %394 = vmatprep.subr.bf16.mxu1 %v751_v32 }
  0x6e   :  { %395 = vmatpush1.bf16.msra.mxu1 %v753_v33 }
  0x6f   :  { %396 = vmatprep.subr.bf16.mxu1 %v754_v34 }
  0x72   :  { %397 = vmatpush1.bf16.msra.mxu1 %v756_v35 }
  0x73   :  { %398 = vmatprep.subr.bf16.mxu1 %v757_v36 }
  0x76   :  { %399 = vmatpush1.bf16.msra.mxu1 %v759_v37 }
 0x112   :  { %v149_v56 = vpop.f32.mrb[0].mxu0 }
 0x113   :  { %v150_v57 = vadd.f32 %v149_v56, %v79_v54  ;;  %v151_v58 = vpop.f32.mrb[1].mxu0 }
 0x114   :  { %v152_v59 = vadd.f32 %v151_v58, %v83_v55  ;;  %v153_v60 = vpop.f32.mrb[2].mxu0 }
 0x115   :  { %v154_v61 = vadd.f32 %v153_v60, %v79_v54  ;;  %v155_v62 = vpop.f32.mrb[3].mxu0  ;;  %v158_v0 = vmax.f32 %v150_v57, 0.0 }
 0x116   :  { %v156_v63 = vadd.f32 %v155_v62, %v83_v55  ;;  %v159_v2 = vmax.f32 %v152_v59, 0.0 }
 0x117   :  { %v160_v1 = vmax.f32 %v154_v61, 0.0 }
 0x118   :  { %v161_v3 = vmax.f32 %v156_v63, 0.0 }
 0x119   :  { %v162_v4 = vpack.c.bf16 %v160_v1, %v158_v0 }
 0x11a   :  { %v163_v5 = vpack.c.bf16 %v161_v3, %v159_v2 }
 0x11c   :  { %400 = vmatprep.mubr.bf16.mxu1 %v163_v5 }
 0x11d   :  { %401 = vmatmul.mubr.bf16.vlgmr.msra.gmra.mrb[0].mxu1 %v162_v4 }
 0x1f0   :  { %v402_v14 = vpop.f32.mrb[0].mxu1 }
 0x1f1   :  { %v403_v15 = vadd.f32 %v402_v14, %v201_v12  ;;  %v404_v16 = vpop.f32.mrb[1].mxu1 }
 0x1f2   :  { %v405_v17 = vadd.f32 %v404_v16, %v205_v13  ;;  %v406_v18 = vpop.f32.mrb[2].mxu1 }
 0x1f3   :  { %v407_v19 = vadd.f32 %v406_v18, %v201_v12  ;;  %v408_v20 = vpop.f32.mrb[3].mxu1  ;;  %v411_v22 = vmax.f32 %v403_v15, 0.0 }
 0x1f4   :  { %v409_v21 = vadd.f32 %v408_v20, %v205_v13  ;;  %v412_v24 = vmax.f32 %v405_v17, 0.0 }
 0x1f5   :  { %v413_v23 = vmax.f32 %v407_v19, 0.0 }
 0x1f6   :  { %v414_v25 = vmax.f32 %v409_v21, 0.0 }
 0x1f7   :  { %v415_v26 = vpack.c.bf16 %v413_v23, %v411_v22 }
 0x1f8   :  { %v416_v27 = vpack.c.bf16 %v414_v25, %v412_v24 }
 0x1fa   :  { %584 = vmatprep.mubr.bf16.mxu0 %v416_v27 }
 0x1fb   :  { %585 = vmatmul.mubr.bf16.vlgmr.msra.gmra.mrb[4].mxu0 %v415_v26 }
 0x2ce   :  { %v691_v28 = vpop.f32.mrb[4].mxu0 }
 0x2cf   :  { %v692_v30 = vpop.f32.mrb[5].mxu0 }
 0x2d0   :  { %v693_v31 = vadd.f32 %v692_v30, %v691_v28  ;;  %v694_v32 = vpop.f32.mrb[6].mxu0 }
 0x2d1   :  { %v695_v33 = vpop.f32.mrb[7].mxu0 }
 0x2d2   :  { %v587_v34 = vadd.f32 %v693_v31, %v649_v29  ;;  %v696_v35 = vadd.f32 %v695_v33, %v694_v32 }
 0x2d4   :  { %v590_v36 = vadd.f32 %v696_v35, %v649_v29  ;;  %776 = vtanh.f32 %v587_v34 }
 0x2d6   :  { %778 = vtanh.f32 %v590_v36 }
 0x2de   :  { %v777_v37 = vpop.eup %776 }
 0x2e0   :  { %v779_v38 = vpop.eup %778 }
 0x2e1   :  { %v673_v39 = vpack.c.bf16 %v779_v38, %v777_v37 }
 0x2e3   :  { %674 = vst [vmem:[%s963_s7] sm:$0xff] %v673_v39  }
 0x2e4   :  { %609 = vsyncpa [#allocation3], 1 }
 0x2e5   :  { %610 = vsyncpa [#allocation5], 1 }

</bundles_post_ra>
